<compile_context>
chip_gen: v7x
topology: tpu7x:2x2x1
jax: 0.10.0
libtpu: 0.0.40
codegen_flags: <defaults>
</compile_context>

<pallas_src>
import functools

import numpy as np
import jax
import jax.numpy as jnp
from jax import lax
from jax.experimental import pallas as pl
from jax.experimental.pallas import tpu as pltpu


def _proto_loss_kernel(n_s, n_q, label_ref, x_ref, out_ref):
    """One grid step == one episode.

    label_ref : SMEM int32 [B, S]     (scalar-prefetch label table)
    x_ref     : VMEM [1, S, T, D]     (one episode, T >= n_s + n_q)
    out_ref   : VMEM f32 [1, 1, 128]  (lane 0 = loss, lane 1 = prec1)
    """
    b = pl.program_id(0)
    S = x_ref.shape[1]
    D = x_ref.shape[3]
    SQ = S * n_q
    f32 = jnp.float32
    eps = f32(1e-6)

    x = x_ref[0]                                                  # [S, T, D], native dtype

    # ---- class prototypes: mean over the n_s support shots (f32 accumulation) ----
    support = x[:, :n_s, :]                                       # [S, n_s, D]
    anchor_f32 = jnp.sum(support.astype(f32), axis=1) * f32(1.0 / n_s)   # [S, D]

    # ---- query block, kept [S, n_q, D] so no in-kernel flatten is needed ----
    qry = x[:, n_s:n_s + n_q, :]                                  # [S, n_q, D], native dtype

    # MXU operand dtype / precision policy (perf-review item 3/4):
    #   * bf16 caller  -> bf16 operands, DEFAULT precision, f32 accumulation (1 MXU pass).
    #   * f32 caller   -> f32 operands, HIGHEST precision on these tiny, latency-hidden
    #                     matmuls so the Gram-identity logits match an f32 reference.
    if x.dtype == jnp.float32:
        mm_prec = lax.Precision.HIGHEST
        anchor_mm = anchor_f32
    else:
        mm_prec = lax.Precision.DEFAULT
        anchor_mm = anchor_f32.astype(x.dtype)

    # ---- cross term 2*q.a via a batched MXU matmul (flash-attn 'bqd,bkd->bqk' form) ----
    anchor_b = jnp.broadcast_to(anchor_mm[None, :, :], (S, S, D))        # [S, S, D]
    cross = jnp.einsum("sqd,sjd->sqj", qry, anchor_b,
                       preferred_element_type=f32,
                       precision=mm_prec)                                 # [S, n_q, S] f32

    # ---- per-class constant of the squared distance.  The per-row constants
    #      (||q||^2 + 2*eps*sum(q) + D*eps^2) are dropped: CE loss and argmax are
    #      exactly invariant to per-row logit shifts, so they are dead work. ----
    a_src = anchor_mm.astype(f32)                                         # [S, D]
    a2 = a_src * a_src - (2.0 * eps) * a_src                              # [S, D]
    # Tiny [1,D]x[D,S] ones-matmul lands a_const directly in lane-major layout.
    a_const = jnp.einsum("kd,sd->ks", jnp.ones((1, D), f32), a2,
                         preferred_element_type=f32,
                         precision=mm_prec).reshape(1, 1, S)              # [1, 1, S]
    # TODO(synk): for large S / long grids, fold a_const into the cross matmul as an
    # extra K column instead of a separate M=1 MXU pass (perf-review item 8).

    # logits up to a per-row constant:  -||q - a + eps||^2  ==  2*q.a - a_const - const(row)
    logits = 2.0 * cross - a_const                                        # [S, n_q, S] f32

    # ---- per-row labels from the SMEM label table ----
    class_idx = lax.broadcasted_iota(jnp.int32, (S, n_q, S), 2)           # [S, n_q, S]
    way_idx = lax.broadcasted_iota(jnp.int32, (S, n_q, 1), 0)             # [S, n_q, 1]
    row_label = jnp.zeros((S, n_q, 1), jnp.int32)
    for w in range(S):  # S is small & static: unrolled scalar SMEM reads
        row_label = jnp.where(way_idx == w, label_ref[b, w], row_label)
    # TODO(synk): for >=32-way episodes, pass a precomputed row-label / one-hot tensor
    # instead of this unrolled select chain (perf-review item 7).
    one_hot = class_idx == row_label                                      # [S, n_q, S]

    # ---- mean cross-entropy ----
    m = jnp.max(logits, axis=-1, keepdims=True)                           # [S, n_q, 1]
    lse = m + jnp.log(jnp.sum(jnp.exp(logits - m), axis=-1, keepdims=True))
    tgt = jnp.sum(jnp.where(one_hot, logits, 0.0), axis=-1, keepdims=True)
    loss = jnp.sum(lse - tgt) * f32(1.0 / SQ)

    # ---- top-1 accuracy (first-argmax tie-break, like torch.topk) ----
    is_max = logits == m
    pred = jnp.min(jnp.where(is_max, class_idx, S), axis=-1, keepdims=True)
    acc = jnp.sum((pred == row_label).astype(f32)) * f32(100.0 / SQ)

    # ---- lane-dense scalar writeback: lane 0 = loss, lane 1 = prec1, rest 0 ----
    lane = lax.broadcasted_iota(jnp.int32, (1, 1, 128), 2)
    out_ref[...] = jnp.where(lane == 0, loss, jnp.where(lane == 1, acc, f32(0.0)))


def proto_loss_batched(x, label, n_s, n_q):
    """x: [B, S, T>=n_s+n_q, D]; label: [B, S] int.  Returns per-episode (loss[B], prec1[B])."""
    B, S, T, D = x.shape
    assert T >= n_s + n_q
    label_i32 = jnp.asarray(label, dtype=jnp.int32).reshape(B, S)

    kernel = functools.partial(_proto_loss_kernel, n_s, n_q)
    # TODO(synk): if episode shapes grow (large S / n_q / D), add a grid over query
    # tiles with pl.when init/finalize accumulators and set vmem_limit_bytes — v5e's
    # 16 MiB / v7x's 32 MiB default scoped-VMEM limits bind first (review items 5/6).
    out = pl.pallas_call(
        kernel,
        out_shape=jax.ShapeDtypeStruct((B, 1, 128), jnp.float32),
        grid_spec=pltpu.PrefetchScalarGridSpec(
            num_scalar_prefetch=1,                      # [B, S] label table -> SMEM
            grid=(B,),                                  # one episode per grid step
            in_specs=[pl.BlockSpec((1, S, T, D), lambda b, lab: (b, 0, 0, 0))],
            out_specs=pl.BlockSpec((1, 1, 128), lambda b, lab: (b, 0, 0)),
        ),
        # "parallel" lets Mosaic shard the episode axis across TensorCores (v7x megacore).
        compiler_params=pltpu.CompilerParams(dimension_semantics=("parallel",)),
    )(label_i32, x)
    return out[:, 0, 0], out[:, 0, 1]


def proto_loss(x, label, n_s, n_q):
    """Module-faithful single-episode interface: x [S, n_s+n_q, D], label [S]."""
    loss, acc = proto_loss_batched(x[None], label[None], n_s, n_q)
    # TODO(synk): torch returns prec1 as a list of 1-element CPU tensors; here it is a scalar.
    return loss[0], acc[0]


def _ref_loss(x, label, n_s, n_q):
    """Pure-JAX f32 reference for correctness checking."""
    S, _, D = x.shape
    xf = x.astype(jnp.float32)
    anchor = jnp.mean(xf[:, :n_s, :], axis=1)
    pos = xf[:, n_s:n_s + n_q, :].reshape(S * n_q, D)
    logits = -jnp.sum((pos[:, None, :] - anchor[None, :, :] + 1e-6) ** 2, axis=-1)
    lab = jnp.repeat(label.astype(jnp.int32), n_q)
    lse = jax.nn.logsumexp(logits, axis=-1)
    nll = lse - logits[jnp.arange(S * n_q), lab]
    loss = jnp.mean(nll)
    acc = 100.0 * jnp.mean((jnp.argmax(logits, axis=-1) == lab).astype(jnp.float32))
    return loss, acc


if __name__ == "__main__":
    # Small episodic shapes: S ways, n_s support shots, n_q query shots, D dims.
    S, n_s, n_q, D = 4, 2, 3, 32
    key = jax.random.PRNGKey(0)
    kx, kl, kb = jax.random.split(key, 3)

    # ---- single episode (module-faithful interface; runs the B=1 grid) ----
    x = jax.random.normal(kx, (S, n_s + n_q, D), dtype=jnp.float32)
    label = jax.random.permutation(kl, jnp.arange(S, dtype=jnp.int32))
    loss, prec1 = proto_loss(x, label, n_s, n_q)
    jax.block_until_ready((loss, prec1))

    ref_loss, ref_acc = _ref_loss(x, label, n_s, n_q)
    # Kernel logits equal the reference logits up to an exact per-row constant (and the
    # Gram/MXU reduction order), so tiny ulp-level drift at |logit|~60 is expected.
    np.testing.assert_allclose(np.asarray(loss), np.asarray(ref_loss), rtol=1e-4, atol=1e-4)
    np.testing.assert_allclose(np.asarray(prec1), np.asarray(ref_acc), rtol=1e-5, atol=1e-5)

    # ---- batched episodes: one pallas_call, grid over B ----
    B = 3
    xb = jax.random.normal(kb, (B, S, n_s + n_q, D), dtype=jnp.float32)
    labelb = jnp.stack([jnp.roll(jnp.arange(S, dtype=jnp.int32), i) for i in range(B)])
    loss_b, acc_b = proto_loss_batched(xb, labelb, n_s, n_q)
    jax.block_until_ready((loss_b, acc_b))
    for i in range(B):
        rl, ra = _ref_loss(xb[i], labelb[i], n_s, n_q)
        np.testing.assert_allclose(np.asarray(loss_b[i]), np.asarray(rl), rtol=1e-4, atol=1e-4)
        np.testing.assert_allclose(np.asarray(acc_b[i]), np.asarray(ra), rtol=1e-5, atol=1e-5)

    # ---- bf16 smoke test: exercises the native-bf16 single-pass MXU path ----
    x16 = x.astype(jnp.bfloat16)
    loss16, acc16 = proto_loss(x16, label, n_s, n_q)
    jax.block_until_ready((loss16, acc16))
    ref16_loss, _ = _ref_loss(x16.astype(jnp.float32), label, n_s, n_q)
    assert bool(jnp.isfinite(loss16)), "bf16 loss not finite"
    assert 0.0 <= float(acc16) <= 100.0, "bf16 prec1 out of range"
    assert abs(float(loss16) - float(ref16_loss)) < 0.5, "bf16 loss too far from reference"

    print("KERNEL_OK")
</pallas_src>

<mosaic_0001>
module attributes {stable_mosaic.version = 11 : i64} {
  func.func @_proto_loss_kernel(%arg0: i32, %arg1: memref<1x4xi32, #tpu.memory_space<smem>>, %arg2: memref<1x4x5x32xf32, #tpu.memory_space<vmem>>, %arg3: memref<1x1x128xf32, #tpu.memory_space<vmem>>) attributes {dimension_semantics = [#tpu.dimension_semantics<parallel>], iteration_bounds = array<i64: 1>, scalar_prefetch = 1 : i64, scratch_operands = 0 : i64, tpu.core_type = #tpu.core_type<tc>, window_params = [{transform_indices = @transform_0, window_bounds = array<i64: 1, 4, 5, 32>}, {transform_indices = @transform_1, window_bounds = array<i64: 1, 1, 128>}]} {
    %c0 = arith.constant 0 : index
    %c0_0 = arith.constant 0 : index
    %c0_1 = arith.constant 0 : index
    %c0_2 = arith.constant 0 : index
    %0 = vector.load %arg2[%c0, %c0_0, %c0_1, %c0_2] : memref<1x4x5x32xf32, #tpu.memory_space<vmem>>, vector<1x4x5x32xf32>
    %1 = vector.shape_cast %0 : vector<1x4x5x32xf32> to vector<4x5x32xf32>
    %2 = vector.extract_strided_slice %1 {offsets = [0, 0, 0], sizes = [4, 2, 32], strides = [1, 1, 1]} : vector<4x5x32xf32> to vector<4x2x32xf32>
    %cst = arith.constant dense<0.000000e+00> : vector<4x32xf32>
    %3 = vector.multi_reduction <add>, %2, %cst [1] : vector<4x2x32xf32> to vector<4x32xf32>
    %cst_3 = arith.constant 5.000000e-01 : f32
    %4 = vector.broadcast %cst_3 : f32 to vector<4x32xf32>
    %5 = arith.mulf %3, %4 : vector<4x32xf32>
    %6 = vector.extract_strided_slice %1 {offsets = [0, 2, 0], sizes = [4, 3, 32], strides = [1, 1, 1]} : vector<4x5x32xf32> to vector<4x3x32xf32>
    %7 = vector.shape_cast %5 : vector<4x32xf32> to vector<1x4x32xf32>
    %8 = vector.shape_cast %7 : vector<1x4x32xf32> to vector<1x4x32xf32>
    %9 = vector.broadcast %8 : vector<1x4x32xf32> to vector<4x4x32xf32>
    "tpu.trace_start"() <{level = 10 : i32, message = "sqd,sjd->sqj"}> : () -> ()
    %cst_4 = arith.constant dense<0.000000e+00> : vector<4x3x4xf32>
    %10 = tpu.matmul %6, %9, %cst_4 {dimension_numbers = #tpu.dot_dimension_numbers<[2], [2], [1], [1], [0, 0, 0, 1, 1, 1], [0], [0]>, precision = #tpu.contract_precision<fp32>} : vector<4x3x32xf32>, vector<4x4x32xf32>, vector<4x3x4xf32> -> vector<4x3x4xf32>
    "tpu.trace_stop"() : () -> ()
    %11 = arith.mulf %5, %5 : vector<4x32xf32>
    %cst_5 = arith.constant 2.000000e+00 : f32
    %cst_6 = arith.constant 9.99999997E-7 : f32
    %12 = arith.mulf %cst_5, %cst_6 : f32
    %13 = vector.broadcast %12 : f32 to vector<4x32xf32>
    %14 = arith.mulf %13, %5 : vector<4x32xf32>
    %15 = arith.subf %11, %14 : vector<4x32xf32>
    %cst_7 = arith.constant 1.000000e+00 : f32
    %16 = vector.broadcast %cst_7 : f32 to vector<1x32xf32>
    "tpu.trace_start"() <{level = 10 : i32, message = "kd,sd->ks"}> : () -> ()
    %cst_8 = arith.constant dense<0.000000e+00> : vector<1x4xf32>
    %17 = tpu.matmul %16, %15, %cst_8 {dimension_numbers = #tpu.dot_dimension_numbers<[1], [1], [0], [0], [0, 0, 1, 0], [], []>, precision = #tpu.contract_precision<fp32>} : vector<1x32xf32>, vector<4x32xf32>, vector<1x4xf32> -> vector<1x4xf32>
    "tpu.trace_stop"() : () -> ()
    %18 = vector.shape_cast %17 : vector<1x4xf32> to vector<1x1x4xf32>
    %cst_9 = arith.constant 2.000000e+00 : f32
    %19 = vector.broadcast %cst_9 : f32 to vector<4x3x4xf32>
    %20 = arith.mulf %19, %10 : vector<4x3x4xf32>
    %21 = vector.broadcast %18 : vector<1x1x4xf32> to vector<4x3x4xf32>
    %22 = arith.subf %20, %21 : vector<4x3x4xf32>
    %23 = tpu.iota {dimensions = array<i32: 2>} : vector<4x3x4xi32>
    %24 = tpu.iota {dimensions = array<i32: 0>} : vector<4x3x1xi32>
    %c0_i32 = arith.constant 0 : i32
    %25 = vector.broadcast %c0_i32 : i32 to vector<4x3x1xi32>
    %c0_i32_10 = arith.constant 0 : i32
    %26 = vector.broadcast %c0_i32_10 : i32 to vector<4x3x1xi32>
    %27 = arith.cmpi eq, %24, %26 : vector<4x3x1xi32>
    %28 = arith.index_cast %arg0 : i32 to index
    %c0_11 = arith.constant 0 : index
    %29 = memref.load %arg1[%28, %c0_11] : memref<1x4xi32, #tpu.memory_space<smem>>
    %30 = vector.broadcast %29 : i32 to vector<4x3x1xi32>
    %31 = arith.select %27, %30, %25 : vector<4x3x1xi1>, vector<4x3x1xi32>
    %c1_i32 = arith.constant 1 : i32
    %32 = vector.broadcast %c1_i32 : i32 to vector<4x3x1xi32>
    %33 = arith.cmpi eq, %24, %32 : vector<4x3x1xi32>
    %34 = arith.index_cast %arg0 : i32 to index
    %c1 = arith.constant 1 : index
    %35 = memref.load %arg1[%34, %c1] : memref<1x4xi32, #tpu.memory_space<smem>>
    %36 = vector.broadcast %35 : i32 to vector<4x3x1xi32>
    %37 = arith.select %33, %36, %31 : vector<4x3x1xi1>, vector<4x3x1xi32>
    %c2_i32 = arith.constant 2 : i32
    %38 = vector.broadcast %c2_i32 : i32 to vector<4x3x1xi32>
    %39 = arith.cmpi eq, %24, %38 : vector<4x3x1xi32>
    %40 = arith.index_cast %arg0 : i32 to index
    %c2 = arith.constant 2 : index
    %41 = memref.load %arg1[%40, %c2] : memref<1x4xi32, #tpu.memory_space<smem>>
    %42 = vector.broadcast %41 : i32 to vector<4x3x1xi32>
    %43 = arith.select %39, %42, %37 : vector<4x3x1xi1>, vector<4x3x1xi32>
    %c3_i32 = arith.constant 3 : i32
    %44 = vector.broadcast %c3_i32 : i32 to vector<4x3x1xi32>
    %45 = arith.cmpi eq, %24, %44 : vector<4x3x1xi32>
    %46 = arith.index_cast %arg0 : i32 to index
    %c3 = arith.constant 3 : index
    %47 = memref.load %arg1[%46, %c3] : memref<1x4xi32, #tpu.memory_space<smem>>
    %48 = vector.broadcast %47 : i32 to vector<4x3x1xi32>
    %49 = arith.select %45, %48, %43 : vector<4x3x1xi1>, vector<4x3x1xi32>
    %50 = vector.broadcast %49 : vector<4x3x1xi32> to vector<4x3x4xi32>
    %51 = arith.cmpi eq, %23, %50 : vector<4x3x4xi32>
    %cst_12 = arith.constant dense<0xFF800000> : vector<4x3xf32>
    %52 = vector.multi_reduction <maximumf>, %22, %cst_12 [2] : vector<4x3x4xf32> to vector<4x3xf32>
    %53 = vector.shape_cast %52 : vector<4x3xf32> to vector<4x3x1xf32>
    %54 = vector.broadcast %53 : vector<4x3x1xf32> to vector<4x3x4xf32>
    %55 = arith.subf %22, %54 : vector<4x3x4xf32>
    %56 = math.exp %55 : vector<4x3x4xf32>
    %cst_13 = arith.constant dense<0.000000e+00> : vector<4x3xf32>
    %57 = vector.multi_reduction <add>, %56, %cst_13 [2] : vector<4x3x4xf32> to vector<4x3xf32>
    %58 = vector.shape_cast %57 : vector<4x3xf32> to vector<4x3x1xf32>
    %59 = math.log %58 : vector<4x3x1xf32>
    %60 = arith.addf %53, %59 : vector<4x3x1xf32>
    %cst_14 = arith.constant 0.000000e+00 : f32
    %61 = vector.broadcast %cst_14 : f32 to vector<4x3x4xf32>
    %62 = arith.select %51, %22, %61 : vector<4x3x4xi1>, vector<4x3x4xf32>
    %cst_15 = arith.constant dense<0.000000e+00> : vector<4x3xf32>
    %63 = vector.multi_reduction <add>, %62, %cst_15 [2] : vector<4x3x4xf32> to vector<4x3xf32>
    %64 = vector.shape_cast %63 : vector<4x3xf32> to vector<4x3x1xf32>
    %65 = arith.subf %60, %64 : vector<4x3x1xf32>
    %66 = vector.shape_cast %65 : vector<4x3x1xf32> to vector<1x4x3x1xf32>
    %cst_16 = arith.constant dense<0.000000e+00> : vector<1xf32>
    %67 = vector.multi_reduction <add>, %66, %cst_16 [1, 2, 3] : vector<1x4x3x1xf32> to vector<1xf32>
    %68 = vector.shape_cast %67 : vector<1xf32> to vector<1x1x1x1xf32>
    %69 = vector.extract %68[0, 0, 0, 0] : f32 from vector<1x1x1x1xf32>
    %cst_17 = arith.constant 0.0833333358 : f32
    %70 = arith.mulf %69, %cst_17 : f32
    %71 = vector.broadcast %53 : vector<4x3x1xf32> to vector<4x3x4xf32>
    %72 = arith.cmpf oeq, %22, %71 : vector<4x3x4xf32>
    %c4_i32 = arith.constant 4 : i32
    %73 = vector.broadcast %c4_i32 : i32 to vector<4x3x4xi32>
    %74 = arith.select %72, %23, %73 : vector<4x3x4xi1>, vector<4x3x4xi32>
    %cst_18 = arith.constant dense<2147483647> : vector<4x3xi32>
    %75 = vector.multi_reduction <minsi>, %74, %cst_18 [2] : vector<4x3x4xi32> to vector<4x3xi32>
    %76 = vector.shape_cast %75 : vector<4x3xi32> to vector<4x3x1xi32>
    %77 = arith.cmpi eq, %76, %49 : vector<4x3x1xi32>
    %78 = arith.extui %77 : vector<4x3x1xi1> to vector<4x3x1xi32>
    %79 = arith.sitofp %78 : vector<4x3x1xi32> to vector<4x3x1xf32>
    %80 = vector.shape_cast %79 : vector<4x3x1xf32> to vector<1x4x3x1xf32>
    %cst_19 = arith.constant dense<0.000000e+00> : vector<1xf32>
    %81 = vector.multi_reduction <add>, %80, %cst_19 [1, 2, 3] : vector<1x4x3x1xf32> to vector<1xf32>
    %82 = vector.shape_cast %81 : vector<1xf32> to vector<1x1x1x1xf32>
    %83 = vector.extract %82[0, 0, 0, 0] : f32 from vector<1x1x1x1xf32>
    %cst_20 = arith.constant 8.33333301 : f32
    %84 = arith.mulf %83, %cst_20 : f32
    %85 = tpu.iota {dimensions = array<i32: 2>} : vector<1x1x128xi32>
    %c0_i32_21 = arith.constant 0 : i32
    %86 = vector.broadcast %c0_i32_21 : i32 to vector<1x1x128xi32>
    %87 = arith.cmpi eq, %85, %86 : vector<1x1x128xi32>
    %c1_i32_22 = arith.constant 1 : i32
    %88 = vector.broadcast %c1_i32_22 : i32 to vector<1x1x128xi32>
    %89 = arith.cmpi eq, %85, %88 : vector<1x1x128xi32>
    %cst_23 = arith.constant 0.000000e+00 : f32
    %90 = vector.broadcast %84 : f32 to vector<1x1x128xf32>
    %91 = vector.broadcast %cst_23 : f32 to vector<1x1x128xf32>
    %92 = arith.select %89, %90, %91 : vector<1x1x128xi1>, vector<1x1x128xf32>
    %93 = vector.broadcast %70 : f32 to vector<1x1x128xf32>
    %94 = arith.select %87, %93, %92 : vector<1x1x128xi1>, vector<1x1x128xf32>
    %c0_24 = arith.constant 0 : index
    %c0_25 = arith.constant 0 : index
    %c0_26 = arith.constant 0 : index
    %95 = vector.load %arg3[%c0_24, %c0_25, %c0_26] : memref<1x1x128xf32, #tpu.memory_space<vmem>>, vector<1x1x128xf32>
    tpu.vector_store %arg3[%c0_24, %c0_25, %c0_26], %94 {strides = array<i32>} : memref<1x1x128xf32, #tpu.memory_space<vmem>>, vector<1x1x128xf32>,
    return
  }
  func.func @transform_0(%arg0: i32, %arg1: memref<1x4xi32, #tpu.memory_space<smem>>) -> (i32, i32, i32, i32) {
    %c0_i32 = arith.constant 0 : i32
    %c0_i32_0 = arith.constant 0 : i32
    %c0_i32_1 = arith.constant 0 : i32
    %c0_i32_2 = arith.constant 0 : i32
    return %arg0, %c0_i32, %c0_i32_0, %c0_i32_1 : i32, i32, i32, i32
  }
  func.func @transform_1(%arg0: i32, %arg1: memref<1x4xi32, #tpu.memory_space<smem>>) -> (i32, i32, i32) {
    %c0_i32 = arith.constant 0 : i32
    %c0_i32_0 = arith.constant 0 : i32
    %c0_i32_1 = arith.constant 0 : i32
    return %arg0, %c0_i32, %c0_i32_0 : i32, i32, i32
  }
}

</mosaic_0001>

<bundles_post_ra>
// kernel: tpu_custom_call.1
= control target key start
LH: loop header
LB: loop body
LE: loop exit
PB: predicated region body
PF: predicated region fallthrough
CT: control target
= control target key end

     0   :  { %s3284_s0 = inlined_call_operand.vmem [shape: s32[1,4], index: 0, kind: input, shape index: {}]   ;;  %s3285_s1 = inlined_call_operand.vmem [shape: f32[1,4,5,32], index: 1, kind: input, shape index: {}]   ;;  %s3286_s2 = inlined_call_operand.hbm [shape: f32[1,1,128], index: 2, kind: output, shape index: {}]  }
   0x1   :  { %s7_s11 = sshll.u32 %s3284_s0, 4  ;;  %s8_s11 = int_to_ptr.vmem [resolvable:$true] %s7_s11 }
   0x2   :  { %s2866_s12 = scalar_lea.vmem %s8_s11, 16  ;;  %p2871_p1 = scmp.lt.s32.totalorder %s8_s11, %s8_s11 }
   0x3   :  { %p2867_p0 = scmp.ne.s32.totalorder %s8_s11, %s2866_s12  ;;  %p2872_p2 = scmp.lt.s32.totalorder %s2866_s12, %s2866_s12 }
   0x5   :  { %p2873_p3 = por %p2872_p2, %p2871_p1 }
   0x7   :  { %p2874_p4 = pnand %p2873_p3, %p2867_p0 }
   0x9   :  { %2877 = shalt.err (!%p2874_p4)  }
   0xa   :  { %s2904_s13 = smov [#allocation3]  }
   0xb   :  { %10 = dma.vmem_to_smem %s8_s11, 16, %s2904_s13, [#allocation2] }
   0xc   :  { %2900 = dma.done.wait [#allocation2], 16 }
   0xd   :  { %2901 = vsyncadd [#allocation2], 4294967280 }
   0xe   :  { %12 = sfence }
   0xf   :  { %v16_v0 = vld [vmem:[%s3285_s1] sm:$0x1f]  ;;  %v2934_v1 = vld [vmem:[%s3285_s1 + $0x8] sm:$0x1f]  ;;  %vm20_vm0 = vcmask 254976   ;;  %v2905_v2 = vmov 0.0  }
  0x10   :  { %2641 = vmatprep.subr.mxu1 %v2905_v2  ;;  %2656 = vmatprep.subr.mxu0 %v2905_v2  ;;  %v18_v3 = vld [vmem:[%s3285_s1 + $0x10] sm:$0x1f]  ;;  %v2944_v4 = vld [vmem:[%s3285_s1 + $0x18] sm:$0x1f]  ;;  %v21_v5 = vsel %vm20_vm0, %v16_v0, 0.0  ;;  %v28_v6 = vsel %vm20_vm0, %v2934_v1, 0.0 }
  0x11   :  { %v22_v7 = vrot.slane %v21_v5, 4  ;;  %v29_v8 = vrot.slane %v28_v6, 4  ;;  %v35_v9 = vsel %vm20_vm0, %v18_v3, 0.0  ;;  %v42_v10 = vsel %vm20_vm0, %v2944_v4, 0.0 }
  0x12   :  { %13 = vsyncpa [#allocation5], 0  ;;  %v36_v11 = vrot.slane %v35_v9, 4  ;;  %v43_v12 = vrot.slane %v42_v10, 4  ;;  %vm65_vm1 = vcmask 261120   ;;  %v54_v17 = vrot.slane %v16_v0, 2 }
  0x13   :  { %v23_v13 = vadd.f32 %v22_v7, %v21_v5  ;;  %v30_v14 = vadd.f32 %v29_v8, %v28_v6  ;;  %vm2906_vm2 = vmmov 0   ;;  %vm59_vm3 = vcmask 1041409   ;;  %s3204_s1 = sld [smem:[#allocation3 + $0x1]]  ;;  %s3206_s21 = sld [smem:[#allocation3]] }
  0x14   :  { %v37_v15 = vadd.f32 %v36_v11, %v35_v9  ;;  %v44_v16 = vadd.f32 %v43_v12, %v42_v10  ;;  %2643 = vmatprep.mubr.msk.f32.mxu1 %vm2906_vm2, %v2905_v2  ;;  %2658 = vmatprep.mubr.msk.f32.mxu0 %vm2906_vm2, %v2905_v2  ;;  %v66_v22 = vsel %vm65_vm1, %v54_v17, 0  ;;  %vm61_vm4 = vcmask 1042434   ;;  %s3224_s22 = sld [smem:[#allocation3 + $0x2]]  ;;  %s3226_s23 = sld [smem:[#allocation3 + $0x3]] }
  0x15   :  { %v24_v18 = vrot.slane %v23_v13, 2  ;;  %v31_v19 = vrot.slane %v30_v14, 2  ;;  %v2953_v25 = vand.u32 4294901760, %v66_v22  ;;  %vm63_vm5 = vcmask 1043459   ;;  %s2909_s28 = smov [#allocation4]  }
  0x16   :  { %v38_v20 = vrot.slane %v37_v15, 2  ;;  %v45_v21 = vrot.slane %v44_v16, 2  ;;  %v517_v46 = vrot.slane %v2934_v1, 2  ;;  %v967_v47 = vrot.slane %v18_v3, 2  ;;  %s2563_s29 = sshll.u32 %s2909_s28, 4  ;;  %s2564_s29 = int_to_ptr.vmem [resolvable:$true] %s2563_s29 }
  0x17   :  { %v25_v23 = vadd.f32 %v24_v18, %v23_v13  ;;  %v32_v24 = vadd.f32 %v31_v19, %v30_v14  ;;  %v137_v30 = vsub.f32 %v66_v22, %v2953_v25  ;;  %v1417_v19 = vrot.slane %v2944_v4, 2  ;;  %s2878_s30 = scalar_lea.vmem %s2564_s29, 16  ;;  %s2882_s3 = scalar_lea.vmem %s2564_s29, 32 }
  0x18   :  { %v39_v26 = vadd.f32 %v38_v20, %v37_v15  ;;  %v46_v27 = vadd.f32 %v45_v21, %v44_v16  ;;  %v518_v52 = vsel %vm65_vm1, %v517_v46, 0  ;;  %v968_v53 = vsel %vm65_vm1, %v967_v47, 0  ;;  %p2879_p5 = scmp.ne.s32.totalorder %s2564_s29, %s2878_s30  ;;  %p2883_p6 = scmp.lt.s32.totalorder %s2564_s29, %s2564_s29 }
  0x19   :  { %v26_v28 = vrot.slane %v25_v23, 1  ;;  %v33_v29 = vrot.slane %v32_v24, 1  ;;  %v138_v37 = vand.u32 4294901760, %v137_v30  ;;  %v2987_v55 = vand.u32 4294901760, %v518_v52  ;;  %p2884_p7 = scmp.lt.s32.totalorder %s2882_s3, %s2878_s30 }
  0x1a   :  { %v40_v31 = vrot.slane %v39_v26, 1  ;;  %v47_v32 = vrot.slane %v46_v27, 1  ;;  %v2989_v56 = vand.u32 4294901760, %v968_v53  ;;  %v1418_v21 = vsel %vm65_vm1, %v1417_v19, 0 }
  0x1b   :  { %v27_v33 = vadd.f32 %v26_v28, %v25_v23  ;;  %v34_v34 = vadd.f32 %v33_v29, %v32_v24  ;;  %v139_v44 = vsub.f32 %v137_v30, %v138_v37  ;;  %v3002_v59 = vsub.f32 %v518_v52, %v2987_v55  ;;  %p2885_p8 = por %p2884_p7, %p2883_p6 }
  0x1c   :  { %v41_v35 = vadd.f32 %v40_v31, %v39_v26  ;;  %v48_v36 = vadd.f32 %v47_v32, %v46_v27  ;;  %v3005_v60 = vsub.f32 %v968_v53, %v2989_v56  ;;  %v3078_v23 = vand.u32 4294901760, %v1418_v21 }
  0x1d   :  { %v2956_v38 = vmul.f32 0.5, %v27_v33  ;;  %v2958_v39 = vmul.f32 0.5, %v34_v34  ;;  %v140_v50 = vand.u32 4294901760, %v139_v44  ;;  %v588_v61 = vand.u32 4294901760, %v3002_v59  ;;  %p2886_p9 = pnand %p2885_p8, %p2879_p5 }
  0x1e   :  { %v2960_v40 = vmul.f32 0.5, %v41_v35  ;;  %v2962_v41 = vmul.f32 0.5, %v48_v36  ;;  %v1038_v62 = vand.u32 4294901760, %v3005_v60  ;;  %v2907_v24 = vmov 0  }
  0x1f   :  { %v60_v42 = vsel %vm59_vm3, %v2958_v39, %v2956_v38  ;;  %v589_v63 = vsub.f32 %v3002_v59, %v588_v61  ;;  %v1866_v5 = vmul.f32 %v2956_v38, %v2956_v38  ;;  %v1867_v6 = vmul.f32 %v2958_v39, %v2958_v39 }
  0x20   :  { %v62_v43 = vsel %vm61_vm4, %v2960_v40, %v60_v42  ;;  %v1039_v0 = vsub.f32 %v3005_v60, %v1038_v62  ;;  %v1870_v7 = vmul.f32 2e-06, %v2956_v38  ;;  %v1871_v8 = vmul.f32 2e-06, %v2958_v39 }
  0x21   :  { %v64_v45 = vsel %vm63_vm5, %v2962_v41, %v62_v43  ;;  %v590_v1 = vand.u32 4294901760, %v589_v63  ;;  %v1868_v9 = vmul.f32 %v2960_v40, %v2960_v40  ;;  %v1872_v10 = vmul.f32 2e-06, %v2960_v40 }
  0x22   :  { %v68_v48 = vsel %vm65_vm1, %v64_v45, 0  ;;  %v1040_v3 = vand.u32 4294901760, %v1039_v0  ;;  %v1874_v11 = vsub.f32 %v1866_v5, %v1870_v7  ;;  %v1875_v12 = vsub.f32 %v1867_v6, %v1871_v8 }
  0x23   :  { %v2973_v49 = vand.u32 4294901760, %v68_v48  ;;  %v1869_v13 = vmul.f32 %v2962_v41, %v2962_v41  ;;  %v1873_v14 = vmul.f32 2e-06, %v2962_v41  ;;  %v1876_v15 = vsub.f32 %v1868_v9, %v1872_v10 }
  0x24   :  { %v1882_v16 = vsel %vm59_vm3, %v1875_v12, %v1874_v11  ;;  %v1487_v26 = vsub.f32 %v1418_v21, %v3078_v23  ;;  %v2908_v38 = vmov 1.0   ;;  %vm2366_vm6 = vcmask 26624  }
  0x25   :  { %2642 = vmatpush3.xpose.msra.mxu1 %v2973_v49  ;;  %2657 = vmatpush3.xpose.msra.mxu0 %v2973_v49  ;;  %v2978_v51 = vsub.f32 %v68_v48, %v2973_v49  ;;  %v1877_v17 = vsub.f32 %v1869_v13, %v1873_v14  ;;  %v1883_v18 = vsel %vm61_vm4, %v1876_v15, %v1882_v16  ;;  %v2340_v48 = vlaneseq }
  0x26   :  { %2661 = vmatprep.subr.mxu0 %v2905_v2  ;;  %2646 = vmatprep.subr.mxu1 %v2905_v2  ;;  %v1488_v29 = vand.u32 4294901760, %v1487_v26  ;;  %vm2435_vm4 = vcmask 2048  }
  0x27   :  { %v2985_v54 = vand.u32 4294901760, %v2978_v51  ;;  %v1884_v20 = vsel %vm63_vm5, %v1877_v17, %v1883_v18  ;;  %v3170_v6 = vand.u32 127, %v2340_v48 }
  0x28   :  { %2644 = vmatmul.mubr.f32.vlgmr.msra.gmra.mrb[0].mxu1 %v140_v50  ;;  %2659 = vmatmul.mubr.f32.vlgmr.msra.gmra.mrb[0].mxu0 %v138_v37  ;;  %v1888_v22 = vsel %vm65_vm1, %v1884_v20, 0  ;;  %v1489_v32 = vsub.f32 %v1487_v26, %v1488_v29 }
  0x29   :  { %2662 = vmatpush3.xpose.msra.mxu0 %v2985_v54  ;;  %v150_v57 = vsub.f32 %v2978_v51, %v2985_v54  ;;  %2648 = vmatprep.mubr.msk.f32.mxu1 %vm2906_vm2, %v2905_v2  ;;  %v3082_v4 = vand.u32 4294901760, %v1888_v22 }
  0x2a   :  { %2663 = vmatprep.mubr.msk.f32.mxu0 %vm2906_vm2, %v2905_v2  ;;  %2666 = vmatprep.subr.mxu0 %v2905_v2  ;;  %v1490_v35 = vand.u32 4294901760, %v1489_v32 }
  0x2b   :  { %v2999_v58 = vand.u32 4294901760, %v150_v57  ;;  %v1968_v28 = vsub.f32 %v1888_v22, %v3082_v4 }
  0x2d   :  { %2647 = vmatpush3.xpose.msra.mxu1 %v2999_v58  ;;  %v1969_v31 = vand.u32 4294901760, %v1968_v28 }
  0x2e   :  { %2651 = vmatprep.subr.mxu1 %v2905_v2 }
  0x2f   :  { %v1970_v34 = vsub.f32 %v1968_v28, %v1969_v31 }
  0x30   :  { %2649 = vmatmul.mubr.f32.vlgmr.msra.gmra.mrb[0].mxu1 %v2953_v25  ;;  %2664 = vmatmul.mubr.f32.vlgmr.msra.gmra.mrb[0].mxu0 %v2953_v25 }
  0x31   :  { %2667 = vmatpush3.xpose.msra.mxu0 %v2973_v49  ;;  %2652 = vmatpush3.xpose.msra.mxu1 %v2978_v51  ;;  %v1971_v37 = vand.u32 4294901760, %v1970_v34 }
  0x32   :  { %2653 = vmatprep.mubr.msk.f32.mxu1 %vm2906_vm2, %v2905_v2  ;;  %2668 = vmatprep.mubr.msk.f32.mxu0 %vm2906_vm2, %v2905_v2 }
  0x33   :  { %2671 = vmatprep.subr.mxu1 %v2905_v2  ;;  %2701 = vmatprep.subr.mxu0 %v2905_v2 }
  0x38   :  { %2654 = vmatmul.mubr.f32.vlgmr.msra.gmra.mrb[0].mxu1 %v137_v30  ;;  %2669 = vmatmul.mubr.f32.vlgmr.msra.gmra.mrb[0].mxu0 %v2953_v25  ;;  %v1886_v25 = vsel %vm65_vm1, 1.0, %v2907_v24 }
  0x39   :  { %2672 = vmatpush3.xpose.msra.mxu1 %v2973_v49  ;;  %2702 = vmatpush3.xpose.msra.mxu0 %v2973_v49  ;;  %v1957_v27 = vsub.f32 %v1886_v25, %v1886_v25 }
  0x3a   :  { %2673 = vmatprep.mubr.msk.f32.mxu1 %vm2906_vm2, %v2905_v2  ;;  %2703 = vmatprep.mubr.msk.f32.mxu0 %vm2906_vm2, %v2905_v2 }
  0x3b   :  { %2706 = vmatprep.subr.mxu0 %v2905_v2  ;;  %2676 = vmatprep.subr.mxu1 %v2905_v2  ;;  %v1958_v30 = vand.u32 4294901760, %v1957_v27 }
  0x3c   :  { %2674 = vmatmul.mubr.f32.vlgmr.msra.gmra.mrb[2].mxu1 %v590_v1  ;;  %2704 = vmatmul.mubr.f32.vlgmr.msra.gmra.mrb[2].mxu0 %v1040_v3 }
  0x3d   :  { %2707 = vmatpush3.xpose.msra.mxu0 %v2999_v58  ;;  %2677 = vmatpush3.xpose.msra.mxu1 %v2999_v58  ;;  %v1959_v33 = vsub.f32 %v1957_v27, %v1958_v30 }
  0x3e   :  { %2678 = vmatprep.mubr.msk.f32.mxu1 %vm2906_vm2, %v2905_v2  ;;  %2708 = vmatprep.mubr.msk.f32.mxu0 %vm2906_vm2, %v2905_v2 }
  0x3f   :  { %2711 = vmatprep.subr.mxu0 %v2905_v2  ;;  %2681 = vmatprep.subr.mxu1 %v2905_v2  ;;  %v1960_v36 = vand.u32 4294901760, %v1959_v33 }
  0x44   :  { %2679 = vmatmul.mubr.f32.vlgmr.msra.gmra.mrb[2].mxu1 %v2987_v55  ;;  %2709 = vmatmul.mubr.f32.vlgmr.msra.gmra.mrb[2].mxu0 %v2989_v56 }
  0x45   :  { %2712 = vmatpush3.xpose.msra.mxu0 %v2978_v51  ;;  %2682 = vmatpush3.xpose.msra.mxu1 %v2978_v51 }
  0x46   :  { %2683 = vmatprep.mubr.msk.f32.mxu1 %vm2906_vm2, %v2905_v2  ;;  %2713 = vmatprep.mubr.msk.f32.mxu0 %vm2906_vm2, %v2905_v2 }
  0x47   :  { %2716 = vmatprep.subr.mxu0 %v2905_v2  ;;  %2686 = vmatprep.subr.mxu1 %v2905_v2 }
  0x4c   :  { %2684 = vmatmul.mubr.f32.vlgmr.msra.gmra.mrb[2].mxu1 %v3002_v59  ;;  %2714 = vmatmul.mubr.f32.vlgmr.msra.gmra.mrb[2].mxu0 %v3005_v60 }
  0x4d   :  { %2717 = vmatpush3.xpose.msra.mxu0 %v2973_v49  ;;  %2687 = vmatpush3.xpose.msra.mxu1 %v2973_v49 }
  0x4e   :  { %2688 = vmatprep.mubr.msk.f32.mxu1 %vm2906_vm2, %v2905_v2  ;;  %2718 = vmatprep.mubr.msk.f32.mxu0 %vm2906_vm2, %v2905_v2 }
  0x4f   :  { %2721 = vmatprep.subr.mxu0 %v2905_v2  ;;  %2691 = vmatprep.subr.mxu1 %v2905_v2 }
  0x54   :  { %2689 = vmatmul.mubr.f32.vlgmr.msra.gmra.mrb[2].mxu1 %v588_v61  ;;  %2719 = vmatmul.mubr.f32.vlgmr.msra.gmra.mrb[2].mxu0 %v1038_v62 }
  0x55   :  { %2722 = vmatpush3.xpose.msra.mxu0 %v2985_v54  ;;  %2692 = vmatpush3.xpose.msra.mxu1 %v2985_v54 }
  0x56   :  { %2693 = vmatprep.mubr.msk.f32.mxu1 %vm2906_vm2, %v2905_v2  ;;  %2723 = vmatprep.mubr.msk.f32.mxu0 %vm2906_vm2, %v2905_v2 }
  0x57   :  { %2726 = vmatprep.subr.mxu0 %v2905_v2  ;;  %2696 = vmatprep.subr.mxu1 %v2905_v2 }
  0x5c   :  { %2694 = vmatmul.mubr.f32.vlgmr.msra.gmra.mrb[2].mxu1 %v2987_v55  ;;  %2724 = vmatmul.mubr.f32.vlgmr.msra.gmra.mrb[2].mxu0 %v2989_v56 }
  0x5d   :  { %2727 = vmatpush3.xpose.msra.mxu0 %v2973_v49  ;;  %2697 = vmatpush3.xpose.msra.mxu1 %v2973_v49 }
  0x5e   :  { %2698 = vmatprep.mubr.msk.f32.mxu1 %vm2906_vm2, %v2905_v2  ;;  %2728 = vmatprep.mubr.msk.f32.mxu0 %vm2906_vm2, %v2905_v2 }
  0x5f   :  { %2731 = vmatprep.subr.mxu1 %v2905_v2  ;;  %2761 = vmatprep.subr.mxu0 %v2905_v2 }
  0x64   :  { %2699 = vmatmul.mubr.f32.vlgmr.msra.gmra.mrb[2].mxu1 %v2987_v55  ;;  %2729 = vmatmul.mubr.f32.vlgmr.msra.gmra.mrb[2].mxu0 %v2989_v56 }
  0x65   :  { %2732 = vmatpush3.xpose.msra.mxu1 %v2973_v49  ;;  %2762 = vmatpush3.xpose.msra.mxu0 %v3082_v4 }
  0x66   :  { %2733 = vmatprep.mubr.msk.f32.mxu1 %vm2906_vm2, %v2905_v2  ;;  %2763 = vmatprep.mubr.msk.f32.mxu0 %vm2906_vm2, %v2905_v2 }
  0x67   :  { %2766 = vmatprep.subr.mxu0 %v2905_v2  ;;  %2736 = vmatprep.subr.mxu1 %v2905_v2 }
  0x68   :  { %2734 = vmatmul.mubr.f32.vlgmr.msra.gmra.mrb[4].mxu1 %v1490_v35  ;;  %2764 = vmatmul.mubr.f32.vlgmr.msra.gmra.mrb[4].mxu0 %v1960_v36  ;;  %v2355_v35 = vstv %s3204_s1 }
  0x69   :  { %2767 = vmatpush3.xpose.msra.mxu0 %v1971_v37  ;;  %2737 = vmatpush3.xpose.msra.mxu1 %v2999_v58  ;;  %vm2363_vm11 = vcmp.eq.s32.totalorder %v3170_v6, %v2355_v35 }
  0x6a   :  { %2738 = vmatprep.mubr.msk.f32.mxu1 %vm2906_vm2, %v2905_v2  ;;  %2768 = vmatprep.mubr.msk.f32.mxu0 %vm2906_vm2, %v2905_v2 }
  0x6b   :  { %2771 = vmatprep.subr.mxu0 %v2905_v2  ;;  %2741 = vmatprep.subr.mxu1 %v2905_v2 }
  0x70   :  { %2739 = vmatmul.mubr.f32.vlgmr.msra.gmra.mrb[4].mxu1 %v3078_v23  ;;  %2769 = vmatmul.mubr.msk.f32.vlgmr.msra.gmra.mrb[4].mxu0 %vm65_vm1, %v2908_v38 }
  0x71   :  { %2772 = vmatpush3.xpose.msra.mxu0 %v1968_v28  ;;  %2742 = vmatpush3.xpose.msra.mxu1 %v2978_v51 }
  0x72   :  { %2743 = vmatprep.mubr.msk.f32.mxu1 %vm2906_vm2, %v2905_v2  ;;  %2773 = vmatprep.mubr.msk.f32.mxu0 %vm2906_vm2, %v2905_v2 }
  0x73   :  { %2776 = vmatprep.subr.mxu0 %v2905_v2  ;;  %2746 = vmatprep.subr.mxu1 %v2905_v2 }
  0x78   :  { %2744 = vmatmul.mubr.f32.vlgmr.msra.gmra.mrb[4].mxu1 %v1487_v26  ;;  %2774 = vmatmul.mubr.f32.vlgmr.msra.gmra.mrb[4].mxu0 %v1957_v27 }
  0x79   :  { %2777 = vmatpush3.xpose.msra.mxu0 %v3082_v4  ;;  %2747 = vmatpush3.xpose.msra.mxu1 %v2973_v49 }
  0x7a   :  { %2748 = vmatprep.mubr.msk.f32.mxu1 %vm2906_vm2, %v2905_v2  ;;  %2778 = vmatprep.mubr.msk.f32.mxu0 %vm2906_vm2, %v2905_v2 }
  0x7b   :  { %2781 = vmatprep.subr.mxu0 %v2905_v2  ;;  %2751 = vmatprep.subr.mxu1 %v2905_v2 }
  0x80   :  { %2749 = vmatmul.mubr.f32.vlgmr.msra.gmra.mrb[4].mxu1 %v1488_v29  ;;  %2779 = vmatmul.mubr.f32.vlgmr.msra.gmra.mrb[4].mxu0 %v1958_v30 }
  0x81   :  { %2782 = vmatpush3.xpose.msra.mxu0 %v1969_v31  ;;  %2752 = vmatpush3.xpose.msra.mxu1 %v2985_v54 }
  0x82   :  { %2753 = vmatprep.mubr.msk.f32.mxu1 %vm2906_vm2, %v2905_v2  ;;  %2783 = vmatprep.mubr.msk.f32.mxu0 %vm2906_vm2, %v2905_v2 }
  0x83   :  { %2786 = vmatprep.subr.mxu0 %v2905_v2  ;;  %2756 = vmatprep.subr.mxu1 %v2905_v2 }
  0x88   :  { %2754 = vmatmul.mubr.f32.vlgmr.msra.gmra.mrb[4].mxu1 %v3078_v23  ;;  %2784 = vmatmul.mubr.msk.f32.vlgmr.msra.gmra.mrb[4].mxu0 %vm65_vm1, %v2908_v38 }
  0x89   :  { %2787 = vmatpush3.xpose.msra.mxu0 %v3082_v4  ;;  %2757 = vmatpush3.xpose.msra.mxu1 %v2973_v49  ;;  %v2341_v49 = vshrl.u32 %v2340_v48, 7 }
  0x8a   :  { %2758 = vmatprep.mubr.msk.f32.mxu1 %vm2906_vm2, %v2905_v2  ;;  %2788 = vmatprep.mubr.msk.f32.mxu0 %vm2906_vm2, %v2905_v2 }
  0x8b   :  { %v2342_v50 = vsub.s32 0, %v2341_v49 }
  0x90   :  { %2759 = vmatmul.mubr.f32.vlgmr.msra.gmra.mrb[4].mxu1 %v3078_v23  ;;  %2789 = vmatmul.mubr.msk.f32.vlgmr.msra.gmra.mrb[4].mxu0 %vm65_vm1, %v2908_v38 }
 0x10b   :  { %v292_v39 = vpop.f32.mrb[0].mxu1  ;;  %v512_v40 = vpop.f32.mrb[0].mxu0 }
 0x10c   :  { %v2791_v41 = vadd.f32 %v512_v40, %v292_v39  ;;  %v2655_v42 = vpop.f32.mrb[1].mxu1  ;;  %v2670_v43 = vpop.f32.mrb[1].mxu0  ;;  %v2352_v39 = vstv %s3206_s21 }
 0x10d   :  { %vm2362_vm12 = vcmp.eq.s32.totalorder %v3170_v6, %v2352_v39 }
 0x10e   :  { %v2336_v51 = vmul.f32 2.0, %v2791_v41 }
 0x137   :  { %v962_v44 = vpop.f32.mrb[2].mxu1  ;;  %v1412_v45 = vpop.f32.mrb[2].mxu0 }
 0x138   :  { %v2700_v46 = vpop.f32.mrb[3].mxu1  ;;  %v2730_v47 = vpop.f32.mrb[3].mxu0  ;;  %v2337_v54 = vmul.f32 2.0, %v962_v44  ;;  %v2338_v55 = vmul.f32 2.0, %v1412_v45 }
 0x163   :  { %v1862_v52 = vpop.f32.mrb[4].mxu1  ;;  %v2332_v53 = vpop.f32.mrb[4].mxu0 }
 0x164   :  { %v2339_v56 = vmul.f32 2.0, %v1862_v52  ;;  %v2343_v57 = vrot.slane %v2332_v53, %v2342_v50  ;;  %v2760_v58 = vpop.f32.mrb[5].mxu1  ;;  %v2790_v59 = vpop.f32.mrb[5].mxu0  ;;  %v2358_v53 = vstv %s3224_s22 }
 0x165   :  { %vm3232_vm14 = vcmp.eq.s32.totalorder %v3170_v6, %v2358_v53 }
 0x166   :  { %v3154_v60 = vsub.f32 %v2338_v55, %v2343_v57  ;;  %v3156_v61 = vsub.f32 %v2336_v51, %v2343_v57  ;;  %v3158_v62 = vsub.f32 %v2337_v54, %v2343_v57  ;;  %v3160_v63 = vsub.f32 %v2339_v56, %v2343_v57 }
 0x168   :  { %v2373_v0 = vsel %vm2366_vm6, %v3154_v60, -inf  ;;  %v2367_v1 = vsel %vm2366_vm6, %v3156_v61, -inf  ;;  %v2370_v3 = vsel %vm2366_vm6, %v3158_v62, -inf  ;;  %v2376_v5 = vsel %vm2366_vm6, %v3160_v63, -inf }
 0x169   :  { %2374 = vmax.xlane.f32.xlu1 %v2373_v0  ;;  %2368 = vmax.xlane.f32.xlu0 %v2367_v1  ;;  %v2416_v43 = vsel %vm2363_vm11, %v3158_v62, 0.0  ;;  %v2415_v46 = vsel %vm2362_vm12, %v3156_v61, 0.0  ;;  %v2361_v0 = vstv %s3226_s23 }
 0x16a   :  { %v2422_v45 = vsel %vm2366_vm6, %v2416_v43, 0.0  ;;  %v2419_v47 = vsel %vm2366_vm6, %v2415_v46, 0.0  ;;  %vm2365_vm1 = vcmp.eq.s32.totalorder %v3170_v6, %v2361_v0 }
 0x16d   :  { %2371 = vmax.xlane.f32.xlu0 %v2370_v3  ;;  %2377 = vmax.xlane.f32.xlu1 %v2376_v5  ;;  %v2417_v3 = vsel %vm3232_vm14, %v3154_v60, 0.0 }
 0x1f6   :  { %v3172_v7 = vpop.xlane.xlu1 %2374  ;;  %v3174_v8 = vpop.xlane.xlu0 %2368 }
 0x1f7   :  { %v2381_v9 = vsub.f32 %v3154_v60, %v3172_v7  ;;  %vm2455_vm7 = vcmp.eq.f32.partialorder %v3154_v60, %v3172_v7  ;;  %v2379_v10 = vsub.f32 %v3156_v61, %v3174_v8  ;;  %vm2453_vm8 = vcmp.eq.f32.partialorder %v3156_v61, %v3174_v8 }
 0x1f8   :  { %v2457_v11 = vsel %vm2453_vm8, %v3170_v6, 4  ;;  %v2459_v12 = vsel %vm2455_vm7, %v3170_v6, 4  ;;  %vm2551_vm8 = vcmp.eq.s32.totalorder %v3170_v6, 1 }
 0x1f9   :  { %v2383_v13 = vmul.f32 1.442695, %v2379_v10  ;;  %v2461_v14 = vsel %vm2366_vm6, %v2457_v11, 2147483647  ;;  %v2387_v15 = vmul.f32 1.442695, %v2381_v9 }
 0x1fa   :  { %v3187_v16 = vpop.xlane.xlu0 %2371  ;;  %v3189_v17 = vpop.xlane.xlu1 %2377  ;;  %v2463_v18 = vshra.s32 %v2461_v14, 16  ;;  %v2491_v19 = vsel %vm2366_vm6, %v2459_v12, 2147483647  ;;  %v2462_v48 = vand.u32 65535, %v2461_v14  ;;  %v2425_v10 = vsel %vm2366_vm6, %v2417_v3, 0.0 }
 0x1fb   :  { %v2380_v20 = vsub.f32 %v3158_v62, %v3187_v16  ;;  %vm2454_vm9 = vcmp.eq.f32.partialorder %v3158_v62, %v3187_v16  ;;  %v2382_v21 = vsub.f32 %v3160_v63, %v3189_v17  ;;  %2850 = vpow2.f32 %v2383_v13 }
 0x1fc   :  { %vm2456_vm10 = vcmp.eq.f32.partialorder %v3160_v63, %v3189_v17  ;;  %v2465_v22 = vcvt.s32.f32 %v2463_v18  ;;  %v2493_v23 = vshra.s32 %v2491_v19, 16  ;;  %v2458_v25 = vsel %vm2454_vm9, %v3170_v6, 4 }
 0x1fd   :  { %v2385_v4 = vmul.f32 1.442695, %v2380_v20  ;;  %v2389_v24 = vmul.f32 1.442695, %v2382_v21  ;;  %v2460_v26 = vsel %vm2456_vm10, %v3170_v6, 4  ;;  %2852 = vpow2.f32 %v2387_v15 }
 0x1fe   :  { %2466 = vmin.xlane.f32.xlu0 %v2465_v22  ;;  %v2476_v27 = vsel %vm2366_vm6, %v2458_v25, 2147483647  ;;  %v2506_v28 = vsel %vm2366_vm6, %v2460_v26, 2147483647  ;;  %v2495_v30 = vcvt.s32.f32 %v2493_v23  ;;  %v2464_v50 = vcvt.s32.f32 %v2462_v48 }
 0x1ff   :  { %2854 = vpow2.f32 %v2385_v4  ;;  %v2478_v29 = vshra.s32 %v2476_v27, 16  ;;  %v2508_v32 = vshra.s32 %v2506_v28, 16  ;;  %v2492_v51 = vand.u32 65535, %v2491_v19 }
 0x200   :  { %2856 = vpow2.f32 %v2389_v24  ;;  %v2477_v52 = vand.u32 65535, %v2476_v27  ;;  %v2507_v61 = vand.u32 65535, %v2506_v28  ;;  %v2418_v12 = vsel %vm2365_vm1, %v3160_v63, 0.0 }
 0x201   :  { %v2480_v31 = vcvt.s32.f32 %v2478_v29  ;;  %v2510_v33 = vcvt.s32.f32 %v2508_v32  ;;  %v2494_v56 = vcvt.s32.f32 %v2492_v51  ;;  %v2428_v13 = vsel %vm2366_vm6, %v2418_v12, 0.0 }
 0x202   :  { %2496 = vmin.xlane.f32.xlu0 %v2495_v30  ;;  %v2479_v59 = vcvt.s32.f32 %v2477_v52  ;;  %v2509_v9 = vcvt.s32.f32 %v2507_v61  ;;  %vm2550_vm9 = vcmp.eq.s32.totalorder %v3170_v6, 0 }
 0x203   :  { %2481 = vmin.xlane.f32.xlu1 %v2480_v31 }
 0x205   :  { %v2851_v34 = vpop.eup %2850 }
 0x206   :  { %v2391_v36 = vsel %vm2366_vm6, %v2851_v34, 0.0 }
 0x207   :  { %2511 = vmin.xlane.f32.xlu1 %v2510_v33  ;;  %v2853_v37 = vpop.eup %2852  ;;  %2392 = vadd.xlane.f32.xlu0 %v2391_v36 }
 0x208   :  { %v2397_v42 = vsel %vm2366_vm6, %v2853_v37, 0.0 }
 0x209   :  { %v2855_v38 = vpop.eup %2854 }
 0x20a   :  { %v2394_v40 = vsel %vm2366_vm6, %v2855_v38, 0.0  ;;  %v2857_v41 = vpop.eup %2856 }
 0x20b   :  { %2395 = vadd.xlane.f32.xlu1 %v2394_v40  ;;  %2398 = vadd.xlane.f32.xlu0 %v2397_v42  ;;  %v2400_v44 = vsel %vm2366_vm6, %v2857_v41, 0.0 }
 0x20f   :  { %2401 = vadd.xlane.f32.xlu1 %v2400_v44  ;;  %2423 = vadd.xlane.f32.xlu0 %v2422_v45 }
 0x213   :  { %2420 = vadd.xlane.f32.xlu1 %v2419_v47 }
 0x28b   :  { %v2467_v49 = vpop.xlane.xlu0 %2466 }
 0x28c   :  { %vm2468_vm13 = vcmp.eq.f32.partialorder %v2465_v22, %v2467_v49  ;;  %v2473_v22 = vcvt.f32.s32 %v2467_v49 }
 0x28d   :  { %v2469_v54 = vsel %vm2468_vm13, %v2464_v50, inf }
 0x28e   :  { %2470 = vmin.xlane.f32.xlu0 %v2469_v54  ;;  %v2474_v63 = vshll.u32 %v2473_v22, 16 }
 0x28f   :  { %v2497_v55 = vpop.xlane.xlu0 %2496 }
 0x290   :  { %v2482_v58 = vpop.xlane.xlu1 %2481  ;;  %vm2498_vm15 = vcmp.eq.f32.partialorder %v2495_v30, %v2497_v55  ;;  %v2503_v26 = vcvt.f32.s32 %v2497_v55 }
 0x291   :  { %v2499_v62 = vsel %vm2498_vm15, %v2494_v56, inf  ;;  %vm2483_vm0 = vcmp.eq.f32.partialorder %v2480_v31, %v2482_v58  ;;  %v2488_v27 = vcvt.f32.s32 %v2482_v58 }
 0x292   :  { %2500 = vmin.xlane.f32.xlu0 %v2499_v62  ;;  %v2484_v1 = vsel %vm2483_vm0, %v2479_v59, inf  ;;  %v2504_v37 = vshll.u32 %v2503_v26, 16 }
 0x293   :  { %2485 = vmin.xlane.f32.xlu1 %v2484_v1  ;;  %v2489_v38 = vshll.u32 %v2488_v27, 16 }
 0x294   :  { %v2512_v5 = vpop.xlane.xlu1 %2511  ;;  %v2393_v14 = vpop.xlane.xlu0 %2392 }
 0x295   :  { %vm2513_vm2 = vcmp.eq.f32.partialorder %v2510_v33, %v2512_v5  ;;  %v2518_v42 = vcvt.f32.s32 %v2512_v5 }
 0x296   :  { %2426 = vadd.xlane.f32.xlu0 %v2425_v10  ;;  %v2514_v11 = vsel %vm2513_vm2, %v2509_v9, inf }
 0x297   :  { %2515 = vmin.xlane.f32.xlu1 %v2514_v11  ;;  %v2519_v52 = vshll.u32 %v2518_v42, 16 }
 0x298   :  { %v2396_v15 = vpop.xlane.xlu1 %2395  ;;  %v2399_v60 = vpop.xlane.xlu0 %2398 }
 0x299   :  { %2858 = vlog2.f32 %v2396_v15 }
 0x29a   :  { %2860 = vlog2.f32 %v2393_v14 }
 0x29b   :  { %2429 = vadd.xlane.f32.xlu1 %v2428_v13  ;;  %2862 = vlog2.f32 %v2399_v60 }
 0x29c   :  { %v2402_v18 = vpop.xlane.xlu1 %2401  ;;  %v2424_v21 = vpop.xlane.xlu0 %2423 }
 0x29d   :  { %2864 = vlog2.f32 %v2402_v18 }
 0x2a0   :  { %v2421_v28 = vpop.xlane.xlu1 %2420 }
 0x2a3   :  { %v2859_v19 = vpop.eup %2858 }
 0x2a4   :  { %v2861_v20 = vpop.eup %2860  ;;  %v2406_v23 = vmul.f32 0.6931472, %v2859_v19 }
 0x2a5   :  { %v2404_v4 = vmul.f32 0.6931472, %v2861_v20  ;;  %v2863_v24 = vpop.eup %2862 }
 0x2a6   :  { %v2412_v30 = vadd.f32 %v2406_v23, %v3187_v16  ;;  %v2408_v31 = vmul.f32 0.6931472, %v2863_v24 }
 0x2a7   :  { %v2411_v32 = vadd.f32 %v2404_v4, %v3174_v8  ;;  %v2865_v34 = vpop.eup %2864 }
 0x2a8   :  { %v2432_v43 = vsub.f32 %v2412_v30, %v2424_v21  ;;  %v2410_v45 = vmul.f32 0.6931472, %v2865_v34  ;;  %v2413_v47 = vadd.f32 %v2408_v31, %v3172_v7 }
 0x2a9   :  { %v2431_v46 = vsub.f32 %v2411_v32, %v2421_v28 }
 0x2aa   :  { %v2437_v54 = vsel %vm2435_vm4, %v2432_v43, 0.0  ;;  %v2414_v56 = vadd.f32 %v2410_v45, %v3189_v17 }
 0x2ab   :  { %v2436_v55 = vsel %vm2435_vm4, %v2431_v46, 0.0 }
 0x2ac   :  { %v2438_v62 = vadd.f32 %v2437_v54, %v2436_v55 }
 0x31b   :  { %v2471_v25 = vpop.xlane.xlu0 %2470 }
 0x31c   :  { %v2472_v29 = vcvt.f32.s32 %v2471_v25 }
 0x31e   :  { %v2475_v33 = vadd.s32 %v2474_v63, %v2472_v29 }
 0x31f   :  { %v2501_v36 = vpop.xlane.xlu0 %2500 }
 0x320   :  { %v2502_v40 = vcvt.f32.s32 %v2501_v36  ;;  %v2486_v41 = vpop.xlane.xlu1 %2485  ;;  %vm2521_vm3 = vcmp.eq.s32.totalorder %v2475_v33, %v2352_v39 }
 0x321   :  { %v2487_v44 = vcvt.f32.s32 %v2486_v41  ;;  %v2577_v49 = vsel %vm2521_vm3, 1.0, %v2905_v2 }
 0x322   :  { %v2505_v16 = vadd.s32 %v2504_v37, %v2502_v40  ;;  %v2533_v59 = vsel %vm2435_vm4, %v2577_v49, 0.0 }
 0x323   :  { %v2490_v8 = vadd.s32 %v2489_v38, %v2487_v44  ;;  %v2427_v48 = vpop.xlane.xlu0 %2426 }
 0x324   :  { %vm2523_vm5 = vcmp.eq.s32.totalorder %v2505_v16, %v2358_v53  ;;  %v2433_v50 = vsub.f32 %v2413_v47, %v2427_v48  ;;  %v2516_v51 = vpop.xlane.xlu1 %2515 }
 0x325   :  { %vm2522_vm6 = vcmp.eq.s32.totalorder %v2490_v8, %v2355_v35  ;;  %v2517_v39 = vcvt.f32.s32 %v2516_v51  ;;  %v2579_v57 = vsel %vm2523_vm5, 1.0, %v2905_v2 }
 0x326   :  { %v2578_v7 = vsel %vm2522_vm6, 1.0, %v2905_v2  ;;  %v2439_v58 = vsel %vm2435_vm4, %v2433_v50, 0.0  ;;  %v2536_v5 = vsel %vm2435_vm4, %v2579_v57, 0.0 }
 0x327   :  { %v2520_v53 = vadd.s32 %v2519_v52, %v2517_v39  ;;  %v2534_v61 = vsel %vm2435_vm4, %v2578_v7, 0.0  ;;  %v2440_v10 = vadd.f32 %v2439_v58, %v2438_v62 }
 0x328   :  { %v2430_v1 = vpop.xlane.xlu1 %2429  ;;  %v2535_v3 = vadd.f32 %v2534_v61, %v2533_v59 }
 0x329   :  { %v2434_v35 = vsub.f32 %v2414_v56, %v2430_v1  ;;  %vm2524_vm7 = vcmp.eq.s32.totalorder %v2520_v53, %v2361_v0 }
 0x32a   :  { %v2580_v9 = vsel %vm2524_vm7, 1.0, %v2905_v2  ;;  %v2537_v17 = vadd.f32 %v2536_v5, %v2535_v3 }
 0x32b   :  { %v2538_v11 = vsel %vm2435_vm4, %v2580_v9, 0.0  ;;  %v2441_v12 = vsel %vm2435_vm4, %v2434_v35, 0.0 }
 0x32c   :  { %v2539_v13 = vadd.f32 %v2538_v11, %v2537_v17  ;;  %v2442_v14 = vadd.f32 %v2441_v12, %v2440_v10 }
 0x32e   :  { %2540 = vadd.xlane.f32.xlu1 %v2539_v13  ;;  %2443 = vadd.xlane.f32.xlu0 %v2442_v14 }
 0x3bb   :  { %v2444_v15 = vpop.xlane.xlu0 %2443  ;;  %v2541_v60 = vpop.xlane.xlu1 %2540 }
 0x3bc   :  { %v2445_v18 = vrot.slane %v2444_v15, 4  ;;  %v2542_v19 = vrot.slane %v2541_v60, 4 }
 0x3be   :  { %v2446_v20 = vadd.f32 %v2445_v18, %v2444_v15  ;;  %v2543_v0 = vadd.f32 %v2542_v19, %v2541_v60 }
 0x3c0   :  { %v2447_v21 = vrot.slane %v2446_v20, 2  ;;  %v2544_v22 = vrot.slane %v2543_v0, 2 }
 0x3c2   :  { %v2545_v23 = vadd.f32 %v2544_v22, %v2543_v0  ;;  %v2448_v2 = vadd.f32 %v2447_v21, %v2446_v20 }
 0x3c4   :  { %v2449_v4 = vrot.slane %v2448_v2, 1  ;;  %v2546_v24 = vrot.slane %v2545_v23, 1 }
 0x3c6   :  { %v2450_v25 = vadd.f32 %v2449_v4, %v2448_v2  ;;  %v2547_v63 = vadd.f32 %v2546_v24, %v2545_v23 }
 0x3c8   :  { %2840 = vpush %v2450_v25 }
 0x3c9   :  { %2842 = vpush %v2547_v63 }
 0x3f9   :  { %s2841_s24 = spop %2840 }
 0x3fa   :  { %s2452_s25 = smul.f32 0.083333336, %s2841_s24  ;;  %s2843_s26 = spop %2842 }
 0x3fb   :  { %s2549_s27 = smul.f32 8.333333, %s2843_s26 }
 0x3fc   :  { %v2554_v26 = vstv %s2452_s25 }
 0x3fd   :  { %v2552_v27 = vstv %s2549_s27 }
 0x3fe   :  { %v2553_v28 = vsel %vm2551_vm8, %v2552_v27, 0.0 }
 0x3ff   :  { %v2555_v29 = vsel %vm2550_vm9, %v2554_v26, %v2553_v28 }
 0x400   :  { %2556 = vst [vmem:[#allocation4] sm:$0x1] %v2555_v29 }
 0x401   :  { %2889 = shalt.err (!%p2886_p9)
}
 0x402   :  { %s2890_s6 = scalar_lea.hbm %s3286_s2, 16 }
 0x403   :  { %p2891_p10 = scmp.ne.s32.totalorder %s3286_s2, %s2890_s6  ;;  %p2894_p11 = scmp.lt.u32.totalorder %s2890_s6, %s3286_s2 }
 0x405   :  { %p2896_p12 = pnand %p2894_p11, %p2891_p10 }
 0x407   :  { %2899 = shalt.err (!%p2896_p12)
}
 0x408   :  { %2566 = dma.vmem_to_hbm [thread:$0]  %s2564_s29, 16, %s3286_s2, [#allocation5]  }
 0x409   :  { %2902 = dma.done.wait [#allocation5], 16  }
 0x40a   :  { %2903 = vsyncadd [#allocation5], 4294967280 }
 0x40b   :  { %2570 = vsyncpa [#allocation5], 1 }

</bundles_post_ra>
